<compile_context>
chip_gen: v5e
topology: v5e:2x2
jax: 0.10.0
libtpu: 0.0.40
codegen_flags: <defaults>
</compile_context>

<pallas_src>
import functools
import math

import jax
import jax.numpy as jnp
from jax.experimental import pallas as pl
from jax.experimental.pallas import tpu as pltpu

HIDDEN = 64


def _val_kernel(x_ref, w1_ref, b1_ref, w2_ref, b2_ref, w3_ref, b3_ref, o_ref,
                *, bf16_act):
    """Fused 3-layer MLP on one feature-major batch tile.

    x_ref : [dim_in, TB] f32 (batch on lanes)
    w1    : [64, dim_in] f32   b1: [64, 1] f32
    w2    : [64, 64]     bf16  b2: [64, 1] f32
    w3    : [64, 1]      f32   b3: [1, 1]  f32
    o_ref : [1, TB]      f32 (lane-dense store)
    """
    x = x_ref[...]                          # [dim_in, TB] f32
    dim_in, tb = x.shape
    w1 = w1_ref[...]                        # [64, dim_in] f32

    # fc1: K = dim_in (tiny) -> VPU broadcast FMAs in f32, not a ~3% MXU matmul.
    acc1 = jnp.broadcast_to(b1_ref[...], (HIDDEN, tb)).astype(jnp.float32)
    for k in range(dim_in):                 # static unroll (dim_in is small)
        acc1 = acc1 + w1[:, k:k + 1] * x[k:k + 1, :]

    if bf16_act:
        # bf16 tanh (v6e/v7x bf16 EUP): halves EUP pushes, feeds MXU directly.
        h1 = jnp.tanh(acc1.astype(jnp.bfloat16))        # [64, TB] bf16
    else:
        # v5e: no bf16 VPU/EUP -> keep tanh in f32, only MXU operands in bf16.
        h1 = jnp.tanh(acc1).astype(jnp.bfloat16)        # [64, TB] bf16

    # fc2: 64x64 contraction on the MXU, bf16 operands / f32 accumulate.
    z2 = jnp.dot(w2_ref[...], h1, preferred_element_type=jnp.float32) + b2_ref[...]
    if bf16_act:
        h2 = jnp.tanh(z2.astype(jnp.bfloat16))          # [64, TB] bf16
    else:
        h2 = jnp.tanh(z2)                               # [64, TB] f32

    # fc3: single output unit -> VPU multiply + cross-sublane (XLU) reduce,
    # accumulated in f32.
    out = jnp.sum(w3_ref[...] * h2.astype(jnp.float32), axis=0, keepdims=True)
    out = out + b3_ref[...]
    o_ref[...] = out.astype(o_ref.dtype)    # [1, TB] lane-dense


def _round_up(n, m):
    return (n + m - 1) // m * m


def _bf16_activations_supported():
    """bf16 VPU/EUP exist on v6e/v7x but not on v5e."""
    try:
        kind = jax.devices()[0].device_kind.lower()
    except Exception:
        return True
    return "v5" not in kind


def _choose_tile(B, tile_b):
    """Pick a lane-aligned batch tile; prefer >=2 grid steps for 2-TC chips."""
    tb = min(tile_b, _round_up(max(B, 1), 128))
    # Give the second TensorCore (v7x) work when the batch is big enough.
    if B > 2 * 128 and pl.cdiv(B, tb) < 2:
        tb = max(128, _round_up(pl.cdiv(B, 2), 128))
    if tb > B:
        # Single small tile: block extent == array extent (valid BlockSpec),
        # avoids any padding at all for tiny batches.
        tb = B
    return tb


def val_forward(x, params, *, tile_b=8192):
    """x: [B, dim_in] float32 -> [B, 1] float32 (same semantics as Val.forward)."""
    B, dim_in = x.shape
    tb = _choose_tile(B, tile_b)
    grid = (pl.cdiv(B, tb),)                # ragged last block handled by Pallas

    bf16_act = _bf16_activations_supported()

    # Feature-major: batch on lanes. No batch padding (output stores past B are
    # masked by Pallas and never read back).
    x_t = x.T                               # [dim_in, B]
    w2_bf16 = params["w2"].astype(jnp.bfloat16)   # hoisted cast (VMEM-resident)

    const = lambda i: (0, 0)  # weights/biases: fetched once, stay VMEM-resident
    out_t = pl.pallas_call(
        functools.partial(_val_kernel, bf16_act=bf16_act),
        out_shape=jax.ShapeDtypeStruct((1, B), jnp.float32),
        grid=grid,
        in_specs=[
            pl.BlockSpec((dim_in, tb), lambda i: (0, i)),   # x: streamed per tile
            pl.BlockSpec((HIDDEN, dim_in), const),          # w1
            pl.BlockSpec((HIDDEN, 1), const),               # b1
            pl.BlockSpec((HIDDEN, HIDDEN), const),          # w2 (bf16)
            pl.BlockSpec((HIDDEN, 1), const),               # b2
            pl.BlockSpec((HIDDEN, 1), const),               # w3 (stored [64, 1])
            pl.BlockSpec((1, 1), const),                    # b3
        ],
        out_specs=pl.BlockSpec((1, tb), lambda i: (0, i)),
        compiler_params=pltpu.CompilerParams(
            dimension_semantics=("parallel",)),             # 2 TCs on v7x
    )(
        x_t,
        params["w1"], params["b1"],
        w2_bf16, params["b2"],
        params["w3"], params["b3"],
    )
    return out_t.reshape(B, 1)


def init_val_params(key, dim_in):
    """torch.nn.Linear default init (U(-1/sqrt(fan_in), +)), feature-major layout."""
    def linear(key, fan_in, fan_out):
        kw, kb = jax.random.split(key)
        bound = 1.0 / math.sqrt(fan_in)
        w = jax.random.uniform(kw, (fan_out, fan_in), jnp.float32, -bound, bound)
        b = jax.random.uniform(kb, (fan_out, 1), jnp.float32, -bound, bound)
        return w, b

    k1, k2, k3 = jax.random.split(key, 3)
    w1, b1 = linear(k1, dim_in, HIDDEN)       # [64, dim_in], [64, 1]
    w2, b2 = linear(k2, HIDDEN, HIDDEN)       # [64, 64],     [64, 1]
    w3_oi, b3 = linear(k3, HIDDEN, 1)         # [1, 64],      [1, 1]
    return {"w1": w1, "b1": b1, "w2": w2, "b2": b2,
            "w3": w3_oi.T, "b3": b3}          # w3 stored as [64, 1]


def val_reference(x, params):
    """Pure-JAX f32 reference (PyTorch semantics) for correctness checks."""
    h1 = jnp.tanh(x @ params["w1"].T + params["b1"].T)
    h2 = jnp.tanh(h1 @ params["w2"].T + params["b2"].T)
    return h2 @ params["w3"] + params["b3"]


if __name__ == "__main__":
    key = jax.random.PRNGKey(0)
    k_params, k_x1, k_x2 = jax.random.split(key, 3)

    dim_in = 4   # cartpole observation dim
    params = init_val_params(k_params, dim_in)

    val_fwd = jax.jit(val_forward)

    # bf16 activations (v6e/v7x) differ from the f32 torch reference at ~1e-2.
    tol = 5e-2

    # Small shape consistent with the module (single exact-extent tile, grid=1).
    x_small = jax.random.normal(k_x1, (8, dim_in), jnp.float32)
    out_small = jax.block_until_ready(val_fwd(x_small, params))
    ref_small = val_reference(x_small, params)
    assert out_small.shape == (8, 1)
    assert jnp.allclose(out_small, ref_small, atol=tol, rtol=tol), float(
        jnp.max(jnp.abs(out_small - ref_small)))

    # Multi-tile path (grid >= 2, ragged last block) to exercise resident
    # weights, the batch pipeline and the masked final store.
    x_big = jax.random.normal(k_x2, (2176, dim_in), jnp.float32)
    out_big = jax.block_until_ready(val_fwd(x_big, params))
    ref_big = val_reference(x_big, params)
    assert out_big.shape == (2176, 1)
    assert jnp.allclose(out_big, ref_big, atol=tol, rtol=tol), float(
        jnp.max(jnp.abs(out_big - ref_big)))

    print("KERNEL_OK")
</pallas_src>

<mosaic_0001>
module attributes {stable_mosaic.version = 11 : i64} {
  func.func @_val_kernel(%arg0: i32, %arg1: memref<4x8xf32, #tpu.memory_space<vmem>>, %arg2: memref<64x4xf32, #tpu.memory_space<vmem>>, %arg3: memref<64x1xf32, #tpu.memory_space<vmem>>, %arg4: memref<64x64xbf16, #tpu.memory_space<vmem>>, %arg5: memref<64x1xf32, #tpu.memory_space<vmem>>, %arg6: memref<64x1xf32, #tpu.memory_space<vmem>>, %arg7: memref<1x1xf32, #tpu.memory_space<vmem>>, %arg8: memref<1x8xf32, #tpu.memory_space<vmem>>) attributes {dimension_semantics = [#tpu.dimension_semantics<parallel>], iteration_bounds = array<i64: 1>, scalar_prefetch = 0 : i64, scratch_operands = 0 : i64, tpu.core_type = #tpu.core_type<tc>, window_params = [{transform_indices = @transform_0, window_bounds = array<i64: 4, 8>}, {pipeline_mode = #tpu.pipeline_mode<synchronous>, transform_indices = @transform_1, window_bounds = array<i64: 64, 4>}, {pipeline_mode = #tpu.pipeline_mode<synchronous>, transform_indices = @transform_2, window_bounds = array<i64: 64, 1>}, {pipeline_mode = #tpu.pipeline_mode<synchronous>, transform_indices = @transform_3, window_bounds = array<i64: 64, 64>}, {pipeline_mode = #tpu.pipeline_mode<synchronous>, transform_indices = @transform_4, window_bounds = array<i64: 64, 1>}, {pipeline_mode = #tpu.pipeline_mode<synchronous>, transform_indices = @transform_5, window_bounds = array<i64: 64, 1>}, {pipeline_mode = #tpu.pipeline_mode<synchronous>, transform_indices = @transform_6, window_bounds = array<i64: 1, 1>}, {transform_indices = @transform_7, window_bounds = array<i64: 1, 8>}]} {
    %c0 = arith.constant 0 : index
    %c0_0 = arith.constant 0 : index
    %0 = vector.load %arg1[%c0, %c0_0] : memref<4x8xf32, #tpu.memory_space<vmem>>, vector<4x8xf32>
    %c0_1 = arith.constant 0 : index
    %c0_2 = arith.constant 0 : index
    %1 = vector.load %arg2[%c0_1, %c0_2] : memref<64x4xf32, #tpu.memory_space<vmem>>, vector<64x4xf32>
    %c0_3 = arith.constant 0 : index
    %c0_4 = arith.constant 0 : index
    %2 = vector.load %arg3[%c0_3, %c0_4] : memref<64x1xf32, #tpu.memory_space<vmem>>, vector<64x1xf32>
    %3 = vector.shape_cast %2 : vector<64x1xf32> to vector<64x1xf32>
    %4 = vector.broadcast %3 : vector<64x1xf32> to vector<64x8xf32>
    %5 = vector.extract_strided_slice %1 {offsets = [0, 0], sizes = [64, 1], strides = [1, 1]} : vector<64x4xf32> to vector<64x1xf32>
    %6 = vector.extract_strided_slice %0 {offsets = [0, 0], sizes = [1, 8], strides = [1, 1]} : vector<4x8xf32> to vector<1x8xf32>
    %7 = vector.broadcast %5 : vector<64x1xf32> to vector<64x8xf32>
    %8 = vector.broadcast %6 : vector<1x8xf32> to vector<64x8xf32>
    %9 = arith.mulf %7, %8 : vector<64x8xf32>
    %10 = arith.addf %4, %9 : vector<64x8xf32>
    %11 = vector.extract_strided_slice %1 {offsets = [0, 1], sizes = [64, 1], strides = [1, 1]} : vector<64x4xf32> to vector<64x1xf32>
    %12 = vector.extract_strided_slice %0 {offsets = [1, 0], sizes = [1, 8], strides = [1, 1]} : vector<4x8xf32> to vector<1x8xf32>
    %13 = vector.broadcast %11 : vector<64x1xf32> to vector<64x8xf32>
    %14 = vector.broadcast %12 : vector<1x8xf32> to vector<64x8xf32>
    %15 = arith.mulf %13, %14 : vector<64x8xf32>
    %16 = arith.addf %10, %15 : vector<64x8xf32>
    %17 = vector.extract_strided_slice %1 {offsets = [0, 2], sizes = [64, 1], strides = [1, 1]} : vector<64x4xf32> to vector<64x1xf32>
    %18 = vector.extract_strided_slice %0 {offsets = [2, 0], sizes = [1, 8], strides = [1, 1]} : vector<4x8xf32> to vector<1x8xf32>
    %19 = vector.broadcast %17 : vector<64x1xf32> to vector<64x8xf32>
    %20 = vector.broadcast %18 : vector<1x8xf32> to vector<64x8xf32>
    %21 = arith.mulf %19, %20 : vector<64x8xf32>
    %22 = arith.addf %16, %21 : vector<64x8xf32>
    %23 = vector.extract_strided_slice %1 {offsets = [0, 3], sizes = [64, 1], strides = [1, 1]} : vector<64x4xf32> to vector<64x1xf32>
    %24 = vector.extract_strided_slice %0 {offsets = [3, 0], sizes = [1, 8], strides = [1, 1]} : vector<4x8xf32> to vector<1x8xf32>
    %25 = vector.broadcast %23 : vector<64x1xf32> to vector<64x8xf32>
    %26 = vector.broadcast %24 : vector<1x8xf32> to vector<64x8xf32>
    %27 = arith.mulf %25, %26 : vector<64x8xf32>
    %28 = arith.addf %22, %27 : vector<64x8xf32>
    %29 = arith.truncf %28 : vector<64x8xf32> to vector<64x8xbf16>
    %30 = math.tanh %29 : vector<64x8xbf16>
    %c0_5 = arith.constant 0 : index
    %c0_6 = arith.constant 0 : index
    %31 = vector.load %arg4[%c0_5, %c0_6] : memref<64x64xbf16, #tpu.memory_space<vmem>>, vector<64x64xbf16>
    %cst = arith.constant dense<0.000000e+00> : vector<64x8xf32>
    %32 = tpu.matmul %31, %30, %cst {dimension_numbers = #tpu.dot_dimension_numbers<[1], [0], [0], [1], [0, 0, 1, 1], [], []>} : vector<64x64xbf16>, vector<64x8xbf16>, vector<64x8xf32> -> vector<64x8xf32>
    %c0_7 = arith.constant 0 : index
    %c0_8 = arith.constant 0 : index
    %33 = vector.load %arg5[%c0_7, %c0_8] : memref<64x1xf32, #tpu.memory_space<vmem>>, vector<64x1xf32>
    %34 = vector.broadcast %33 : vector<64x1xf32> to vector<64x8xf32>
    %35 = arith.addf %32, %34 : vector<64x8xf32>
    %36 = arith.truncf %35 : vector<64x8xf32> to vector<64x8xbf16>
    %37 = math.tanh %36 : vector<64x8xbf16>
    %c0_9 = arith.constant 0 : index
    %c0_10 = arith.constant 0 : index
    %38 = vector.load %arg6[%c0_9, %c0_10] : memref<64x1xf32, #tpu.memory_space<vmem>>, vector<64x1xf32>
    %39 = arith.extf %37 : vector<64x8xbf16> to vector<64x8xf32>
    %40 = vector.broadcast %38 : vector<64x1xf32> to vector<64x8xf32>
    %41 = arith.mulf %40, %39 : vector<64x8xf32>
    %cst_11 = arith.constant dense<0.000000e+00> : vector<8xf32>
    %42 = vector.multi_reduction <add>, %41, %cst_11 [0] : vector<64x8xf32> to vector<8xf32>
    %43 = vector.shape_cast %42 : vector<8xf32> to vector<1x8xf32>
    %c0_12 = arith.constant 0 : index
    %c0_13 = arith.constant 0 : index
    %44 = vector.load %arg7[%c0_12, %c0_13] : memref<1x1xf32, #tpu.memory_space<vmem>>, vector<1x1xf32>
    %45 = vector.broadcast %44 : vector<1x1xf32> to vector<1x8xf32>
    %46 = arith.addf %43, %45 : vector<1x8xf32>
    %c0_14 = arith.constant 0 : index
    %c0_15 = arith.constant 0 : index
    %47 = vector.load %arg8[%c0_14, %c0_15] : memref<1x8xf32, #tpu.memory_space<vmem>>, vector<1x8xf32>
    tpu.vector_store %arg8[%c0_14, %c0_15], %46 {strides = array<i32>} : memref<1x8xf32, #tpu.memory_space<vmem>>, vector<1x8xf32>,
    return
  }
  func.func @transform_0(%arg0: i32) -> (i32, i32) {
    %c0_i32 = arith.constant 0 : i32
    %c0_i32_0 = arith.constant 0 : i32
    return %c0_i32, %arg0 : i32, i32
  }
  func.func @transform_1(%arg0: i32) -> (i32, i32) {
    %c0_i32 = arith.constant 0 : i32
    %c0_i32_0 = arith.constant 0 : i32
    %c0_i32_1 = arith.constant 0 : i32
    return %c0_i32, %c0_i32_0 : i32, i32
  }
  func.func @transform_2(%arg0: i32) -> (i32, i32) {
    %c0_i32 = arith.constant 0 : i32
    %c0_i32_0 = arith.constant 0 : i32
    %c0_i32_1 = arith.constant 0 : i32
    return %c0_i32, %c0_i32_0 : i32, i32
  }
  func.func @transform_3(%arg0: i32) -> (i32, i32) {
    %c0_i32 = arith.constant 0 : i32
    %c0_i32_0 = arith.constant 0 : i32
    %c0_i32_1 = arith.constant 0 : i32
    return %c0_i32, %c0_i32_0 : i32, i32
  }
  func.func @transform_4(%arg0: i32) -> (i32, i32) {
    %c0_i32 = arith.constant 0 : i32
    %c0_i32_0 = arith.constant 0 : i32
    %c0_i32_1 = arith.constant 0 : i32
    return %c0_i32, %c0_i32_0 : i32, i32
  }
  func.func @transform_5(%arg0: i32) -> (i32, i32) {
    %c0_i32 = arith.constant 0 : i32
    %c0_i32_0 = arith.constant 0 : i32
    %c0_i32_1 = arith.constant 0 : i32
    return %c0_i32, %c0_i32_0 : i32, i32
  }
  func.func @transform_6(%arg0: i32) -> (i32, i32) {
    %c0_i32 = arith.constant 0 : i32
    %c0_i32_0 = arith.constant 0 : i32
    %c0_i32_1 = arith.constant 0 : i32
    return %c0_i32, %c0_i32_0 : i32, i32
  }
  func.func @transform_7(%arg0: i32) -> (i32, i32) {
    %c0_i32 = arith.constant 0 : i32
    %c0_i32_0 = arith.constant 0 : i32
    return %c0_i32, %arg0 : i32, i32
  }
}

</mosaic_0001>

<bundles_post_ra>
// kernel: val_forward.1
= control target key start
LH: loop header
LB: loop body
LE: loop exit
PB: predicated region body
PF: predicated region fallthrough
CT: control target
= control target key end

     0   :  { %s946_s0 = inlined_call_operand.vmem [shape: f32[4,8], index: 0, kind: input, shape index: {}]   ;;  %s947_s1 = inlined_call_operand.vmem [shape: f32[64,4], index: 1, kind: input, shape index: {}]   ;;  %s948_s2 = inlined_call_operand.vmem [shape: f32[64,1], index: 2, kind: input, shape index: {}]   ;;  %s949_s3 = inlined_call_operand.vmem [shape: bf16[64,64], index: 3, kind: input, shape index: {}]   ;;  %s950_s4 = inlined_call_operand.vmem [shape: f32[64,1], index: 4, kind: input, shape index: {}]   ;;  %s951_s5 = inlined_call_operand.vmem [shape: f32[64,1], index: 5, kind: input, shape index: {}]   ;;  %s952_s6 = inlined_call_operand.<no memory space> [shape: f32[1,1], index: 6, kind: input, shape index: {}]   ;;  %s953_s7 = inlined_call_operand.hbm [shape: f32[1,8], index: 7, kind: output, shape index: {}]  }
   0x1   :  { %v12_v0 = vstv %s952_s6 }
   0x2   :  { %13 = vst [vmem:[#allocation2] sm:$0x1] %v12_v0 }
   0x3   :  { %v43_v1 = vld [vmem:[%s948_s2 + $0x20] sm:$0xff]  ;;  %v41_v2 = vld [vmem:[%s948_s2 + $0x10] sm:$0xff]  ;;  %v700_v4 = vmov 0  }
   0x4   :  { %v39_v3 = vld [vmem:[%s948_s2] sm:$0xff]  ;;  %620 = vset.pattern.permute.xlu2 %v700_v4  ;;  %619 = vset.pattern.permute.xlu1 %v700_v4 }
   0x5   :  { %618 = vset.pattern.permute.xlu0 %v700_v4  ;;  %69 = vperm.xlu2 %620, %v43_v1  }
   0x6   :  { %59 = vperm.xlu1 %619, %v41_v2   ;;  %49 = vperm.xlu0 %618, %v39_v3  }
   0x7   :  { %14 = vsyncpa [#allocation4], 0  ;;  %v44_v5 = vld [vmem:[%s948_s2 + $0x28] sm:$0xff]  ;;  %v42_v6 = vld [vmem:[%s948_s2 + $0x18] sm:$0xff]  ;;  %v701_v18 = vmov 1   ;;  %v702_v19 = vmov 2  }
   0x8   :  { %v40_v7 = vld [vmem:[%s948_s2 + $0x8] sm:$0xff]  ;;  %v772_v8 = vld [vmem:[%s947_s1] sm:$0xff]  ;;  %v46_v9 = vld [vmem:[%s948_s2 + $0x38] sm:$0xff]  ;;  %v703_v20 = vmov 3   ;;  %vm391_vm0 = vcmask 523264   ;;  %vm529_vm1 = vcmask 64512  }
   0x9   :  { %v45_v10 = vld [vmem:[%s948_s2 + $0x30] sm:$0xff]  ;;  %v34_v11 = vld [vmem:[%s947_s1 + $0x18] sm:$0xff]  ;;  %v32_v13 = vld [vmem:[%s947_s1 + $0x8] sm:$0xff]  ;;  %s568_s23 = sshll.u32 %s953_s7, 4  ;;  %vm559_vm2 = vcmask 57344   ;;  %s569_s23 = int_to_ptr.hbm [resolvable:$true] %s568_s23 }
   0xa   :  { %v33_v12 = vld [vmem:[%s947_s1 + $0x10] sm:$0xff]  ;;  %v36_v15 = vld [vmem:[%s947_s1 + $0x28] sm:$0xff]  ;;  %v35_v16 = vld [vmem:[%s947_s1 + $0x20] sm:$0xff] }
   0xb   :  { %v37_v14 = vld [vmem:[%s947_s1 + $0x30] sm:$0xff]  ;;  %v38_v17 = vld [vmem:[%s947_s1 + $0x38] sm:$0xff]  ;;  %v30_v23 = vld [vmem:[%s946_s0] sm:$0xf] }
   0xc   :  { %v812_v24 = vperm.slane %v30_v23, 0  ;;  %v323_v55 = vld [vmem:[%s950_s4] sm:$0xff]  ;;  %v834_v57 = vperm.slane %v30_v23, 1  ;;  %v837_v59 = vperm.slane %v30_v23, 2  ;;  %v843_v63 = vperm.slane %v30_v23, 3 }
   0xd   :  { %74 = vperm.xlu2 %620, %v44_v5   ;;  %v325_v5 = vld [vmem:[%s950_s4 + $0x10] sm:$0xff] }
   0xe   :  { %64 = vperm.xlu1 %619, %v42_v6   ;;  %54 = vperm.xlu0 %618, %v40_v7  }
  0x15   :  { %89 = vperm.xlu2 %620, %v772_v8  }
  0x16   :  { %84 = vperm.xlu1 %619, %v46_v9   ;;  %79 = vperm.xlu0 %618, %v45_v10  }
  0x1d   :  { %104 = vperm.xlu2 %620, %v34_v11  }
  0x1e   :  { %99 = vperm.xlu1 %619, %v33_v12   ;;  %94 = vperm.xlu0 %618, %v32_v13  }
  0x25   :  { %119 = vperm.xlu2 %620, %v37_v14  }
  0x26   :  { %114 = vperm.xlu1 %619, %v36_v15   ;;  %109 = vperm.xlu0 %618, %v35_v16  }
  0x2d   :  { %622 = vset.pattern.permute.xlu2 %v701_v18 }
  0x2e   :  { %621 = vset.pattern.permute.xlu1 %v701_v18  ;;  %124 = vperm.xlu0 %618, %v38_v17  }
  0x2f   :  { %169 = vperm.xlu1 %621, %v37_v14   ;;  %173 = vperm.xlu2 %622, %v38_v17  }
  0x36   :  { %623 = vset.pattern.permute.xlu0 %v702_v19 }
  0x37   :  { %624 = vset.pattern.permute.xlu1 %v702_v19  ;;  %218 = vperm.xlu0 %623, %v37_v14  }
  0x38   :  { %161 = vperm.xlu2 %622, %v35_v16   ;;  %222 = vperm.xlu1 %624, %v38_v17  }
  0x3f   :  { %206 = vperm.xlu0 %623, %v34_v11  }
  0x40   :  { %626 = vset.pattern.permute.xlu2 %v703_v20  ;;  %625 = vset.pattern.permute.xlu1 %v701_v18 }
  0x41   :  { %267 = vperm.xlu2 %626, %v37_v14   ;;  %165 = vperm.xlu1 %625, %v36_v15  }
  0x47   :  { %194 = vperm.xlu0 %623, %v772_v8  }
  0x49   :  { %628 = vset.pattern.permute.xlu2 %v702_v19  ;;  %627 = vset.pattern.permute.xlu1 %v702_v19 }
  0x4a   :  { %214 = vperm.xlu2 %628, %v36_v15   ;;  %210 = vperm.xlu1 %627, %v35_v16  }
  0x4f   :  { %637 = vset.pattern.permute.xlu0 %v703_v20 }
  0x50   :  { %271 = vperm.xlu0 %637, %v38_v17  }
  0x52   :  { %630 = vset.pattern.permute.xlu2 %v701_v18  ;;  %629 = vset.pattern.permute.xlu1 %v701_v18 }
  0x53   :  { %157 = vperm.xlu2 %630, %v34_v11   ;;  %153 = vperm.xlu1 %629, %v33_v12  }
  0x58   :  { %259 = vperm.xlu0 %637, %v35_v16  }
  0x5b   :  { %632 = vset.pattern.permute.xlu2 %v702_v19  ;;  %631 = vset.pattern.permute.xlu1 %v703_v20 }
  0x5c   :  { %202 = vperm.xlu2 %632, %v33_v12   ;;  %263 = vperm.xlu1 %631, %v36_v15  }
  0x5f   :  { %v803_v21 = vpop.permute.xlu2 %69 }
  0x60   :  { %247 = vperm.xlu0 %637, %v32_v13  }
  0x64   :  { %634 = vset.pattern.permute.xlu2 %v701_v18  ;;  %633 = vset.pattern.permute.xlu1 %v701_v18 }
  0x65   :  { %149 = vperm.xlu2 %634, %v32_v13   ;;  %145 = vperm.xlu1 %633, %v772_v8  }
  0x67   :  { %v807_v22 = vpop.permute.xlu2 %74 }
  0x68   :  { %641 = vset.pattern.permute.xlu0 %v700_v4 }
  0x6d   :  { %636 = vset.pattern.permute.xlu2 %v703_v20  ;;  %635 = vset.pattern.permute.xlu1 %v703_v20  ;;  %v328_v20 = vld [vmem:[%s950_s4 + $0x28] sm:$0xff] }
  0x6e   :  { %255 = vperm.xlu2 %636, %v34_v11   ;;  %251 = vperm.xlu1 %635, %v33_v12  }
  0x6f   :  { %v90_v25 = vpop.permute.xlu2 %89 }
  0x70   :  { %v128_v26 = vmul.f32 %v812_v24, %v90_v25 }
  0x76   :  { %638 = vset.pattern.permute.xlu1 %v702_v19  ;;  %243 = vperm.xlu2 %636, %v772_v8  }
  0x77   :  { %198 = vperm.xlu1 %638, %v32_v13   ;;  %v105_v30 = vpop.permute.xlu2 %104 }
  0x78   :  { %v60_v27 = vpop.permute.xlu1 %59  ;;  %v50_v28 = vpop.permute.xlu0 %49  ;;  %v131_v31 = vmul.f32 %v812_v24, %v105_v30 }
  0x79   :  { %v816_v29 = vadd.f32 %v128_v26, %v50_v28 }
  0x7e   :  { %640 = vset.pattern.permute.xlu2 %v700_v4 }
  0x7f   :  { %639 = vset.pattern.permute.xlu1 %v700_v4  ;;  %v120_v37 = vpop.permute.xlu2 %119 }
  0x80   :  { %v65_v32 = vpop.permute.xlu1 %64  ;;  %v55_v33 = vpop.permute.xlu0 %54  ;;  %333 = vperm.xlu1 %639, %v323_v55   ;;  %v134_v61 = vmul.f32 %v812_v24, %v120_v37  ;;  %v324_v55 = vld [vmem:[%s950_s4 + $0x8] sm:$0xff] }
  0x81   :  { %v821_v34 = vadd.f32 %v131_v31, %v65_v32  ;;  %338 = vperm.xlu2 %640, %v324_v55  }
  0x88   :  { %v85_v35 = vpop.permute.xlu1 %84  ;;  %v80_v36 = vpop.permute.xlu0 %79  ;;  %343 = vperm.xlu1 %639, %v325_v5  }
  0x89   :  { %v174_v44 = vpop.permute.xlu2 %173  ;;  %v142_v1 = vadd.f32 %v134_v61, %v80_v36 }
  0x8a   :  { %v184_v2 = vmul.f32 %v834_v57, %v174_v44 }
  0x90   :  { %v100_v38 = vpop.permute.xlu1 %99  ;;  %v95_v39 = vpop.permute.xlu0 %94  ;;  %358 = vperm.xlu1 %639, %v328_v20  }
  0x91   :  { %v130_v40 = vmul.f32 %v812_v24, %v100_v38  ;;  %v129_v41 = vmul.f32 %v812_v24, %v95_v39  ;;  %v330_v39 = vld [vmem:[%s950_s4 + $0x38] sm:$0xff] }
  0x92   :  { %v162_v49 = vpop.permute.xlu2 %161 }
  0x93   :  { %v825_v42 = vadd.f32 %v130_v40, %v60_v27  ;;  %v827_v43 = vadd.f32 %v129_v41, %v55_v33  ;;  %v181_v26 = vmul.f32 %v834_v57, %v162_v49 }
  0x98   :  { %v115_v45 = vpop.permute.xlu1 %114  ;;  %v110_v46 = vpop.permute.xlu0 %109  ;;  %368 = vperm.xlu1 %639, %v330_v39  }
  0x99   :  { %v133_v15 = vmul.f32 %v812_v24, %v115_v45  ;;  %v132_v16 = vmul.f32 %v812_v24, %v110_v46 }
  0x9b   :  { %v268_v52 = vpop.permute.xlu2 %267  ;;  %v141_v28 = vadd.f32 %v133_v15, %v807_v22  ;;  %v140_v30 = vadd.f32 %v132_v16, %v803_v21  ;;  %v551_v15 = vld [vmem:[#allocation2] sm:$0x1] }
  0x9c   :  { %v281_v9 = vmul.f32 %v843_v63, %v268_v52 }
  0x9d   :  { %v189_v37 = vadd.f32 %v181_v26, %v140_v30 }
  0xa0   :  { %v125_v47 = vpop.permute.xlu0 %124 }
  0xa1   :  { %v170_v48 = vpop.permute.xlu1 %169  ;;  %v135_v58 = vmul.f32 %v812_v24, %v125_v47 }
  0xa2   :  { %v183_v62 = vmul.f32 %v834_v57, %v170_v48 }
  0xa3   :  { %v143_v3 = vadd.f32 %v135_v58, %v85_v35 }
  0xa4   :  { %v215_v56 = vpop.permute.xlu2 %214  ;;  %v191_v6 = vadd.f32 %v183_v62, %v142_v1 }
  0xa5   :  { %v192_v11 = vadd.f32 %v184_v2, %v143_v3  ;;  %v231_v33 = vmul.f32 %v837_v59, %v215_v56 }
  0xa9   :  { %v219_v50 = vpop.permute.xlu0 %218 }
  0xaa   :  { %v223_v51 = vpop.permute.xlu1 %222  ;;  %v232_v4 = vmul.f32 %v837_v59, %v219_v50 }
  0xab   :  { %v233_v7 = vmul.f32 %v837_v59, %v223_v51 }
  0xac   :  { %v240_v10 = vadd.f32 %v232_v4, %v191_v6 }
  0xad   :  { %v158_v8 = vpop.permute.xlu2 %157  ;;  %v241_v13 = vadd.f32 %v233_v7, %v192_v11 }
  0xae   :  { %v289_v17 = vadd.f32 %v281_v9, %v240_v10  ;;  %v180_v61 = vmul.f32 %v834_v57, %v158_v8  ;;  %v326_v8 = vld [vmem:[%s950_s4 + $0x18] sm:$0xff]  ;;  %v327_v10 = vld [vmem:[%s950_s4 + $0x20] sm:$0xff] }
  0xaf   :  { %348 = vperm.xlu2 %640, %v326_v8   ;;  %353 = vperm.xlu0 %641, %v327_v10  }
  0xb0   :  { %v188_v6 = vadd.f32 %v180_v61, %v821_v34 }
  0xb1   :  { %v829_v53 = vpop.permute.xlu0 %206 }
  0xb2   :  { %v229_v2 = vmul.f32 %v837_v59, %v829_v53 }
  0xb3   :  { %v166_v54 = vpop.permute.xlu1 %165 }
  0xb4   :  { %v182_v23 = vmul.f32 %v834_v57, %v166_v54  ;;  %v467_v54 = vld [vmem:[%s951_s5 + $0x10] sm:$0xff]  ;;  %v237_v11 = vadd.f32 %v229_v2, %v188_v6 }
  0xb5   :  { %493 = vperm.xlu1 %639, %v467_v54  }
  0xb6   :  { %v203_v27 = vpop.permute.xlu2 %202  ;;  %v190_v35 = vadd.f32 %v182_v23, %v141_v28 }
  0xb7   :  { %v228_v3 = vmul.f32 %v837_v59, %v203_v27 }
  0xb8   :  { %v239_v40 = vadd.f32 %v231_v33, %v190_v35 }
  0xb9   :  { %v839_v60 = vpop.permute.xlu0 %194 }
  0xba   :  { %v226_v27 = vmul.f32 %v837_v59, %v839_v60  ;;  %v465_v60 = vld [vmem:[%s951_s5] sm:$0xff] }
  0xbc   :  { %v211_v0 = vpop.permute.xlu1 %210 }
  0xbd   :  { %v230_v36 = vmul.f32 %v837_v59, %v211_v0  ;;  %v470_v0 = vld [vmem:[%s951_s5 + $0x28] sm:$0xff] }
  0xbe   :  { %508 = vperm.xlu1 %639, %v470_v0  }
  0xbf   :  { %v238_v21 = vadd.f32 %v230_v36, %v189_v37  ;;  %v150_v48 = vpop.permute.xlu2 %149 }
  0xc0   :  { %v178_v16 = vmul.f32 %v834_v57, %v150_v48  ;;  %v471_v48 = vld [vmem:[%s951_s5 + $0x30] sm:$0xff] }
  0xc2   :  { %v272_v12 = vpop.permute.xlu0 %271 }
  0xc3   :  { %v282_v14 = vmul.f32 %v843_v63, %v272_v12 }
  0xc5   :  { %v290_v18 = vadd.f32 %v282_v14, %v241_v13  ;;  %v154_v19 = vpop.permute.xlu1 %153 }
  0xc6   :  { %v179_v58 = vmul.f32 %v834_v57, %v154_v19  ;;  %v466_v19 = vld [vmem:[%s951_s5 + $0x8] sm:$0xff]  ;;  %554 = vperm.xlu1 %639, %v551_v15  }
  0xc7   :  { %v294_v25 = vpack.c.bf16 %v290_v18, %v289_v17  ;;  %v329_v18 = vld [vmem:[%s950_s4 + $0x30] sm:$0xff]  ;;  %488 = vperm.xlu0 %641, %v466_v19  }
  0xc8   :  { %v256_v62 = vpop.permute.xlu2 %255  ;;  %v187_v4 = vadd.f32 %v179_v58, %v825_v42  ;;  %363 = vperm.xlu2 %640, %v329_v18  }
  0xc9   :  { %v301_v31 = vunpack.c.l.bf16 %v294_v25  ;;  %v302_v24 = vunpack.c.h.bf16 %v294_v25  ;;  %v278_v7 = vmul.f32 %v843_v63, %v256_v62 }
  0xca   :  { %v260_v32 = vpop.permute.xlu0 %259  ;;  %v236_v42 = vadd.f32 %v228_v3, %v187_v4 }
  0xcb   :  { %642 = vtanh.f32 %v301_v31  ;;  %v279_v38 = vmul.f32 %v843_v63, %v260_v32  ;;  %v286_v13 = vadd.f32 %v278_v7, %v237_v11 }
  0xcc   :  { %644 = vtanh.f32 %v302_v24 }
  0xcd   :  { %v287_v45 = vadd.f32 %v279_v38, %v238_v21 }
  0xce   :  { %v264_v22 = vpop.permute.xlu1 %263 }
  0xcf   :  { %v280_v41 = vmul.f32 %v843_v63, %v264_v22 }
  0xd0   :  { %v244_v23 = vpop.permute.xlu2 %243  ;;  %483 = vperm.xlu2 %640, %v465_v60  }
  0xd1   :  { %v643_v44 = vpop.eup %642  ;;  %v288_v46 = vadd.f32 %v280_v41, %v239_v40  ;;  %v275_v24 = vmul.f32 %v843_v63, %v244_v23  ;;  %v472_v40 = vld [vmem:[%s951_s5 + $0x38] sm:$0xff] }
  0xd2   :  { %v645_v47 = vpop.eup %644  ;;  %v248_v28 = vpop.permute.xlu0 %247 }
  0xd3   :  { %v293_v49 = vpack.c.bf16 %v288_v46, %v287_v45  ;;  %v314_v50 = vpack.c.bf16 %v645_v47, %v643_v44  ;;  %v276_v32 = vmul.f32 %v843_v63, %v248_v28  ;;  %v597_v46 = vld [vmem:[%s949_s3] sm:$0xff]  ;;  %v598_v47 = vld [vmem:[%s949_s3 + $0x8] sm:$0xff] }
  0xd5   :  { %v299_v51 = vunpack.c.l.bf16 %v293_v49  ;;  %v300_v52 = vunpack.c.h.bf16 %v293_v49  ;;  %408 = vmatpush.bf16.msra.mxu0 %v314_v50  ;;  %601 = vmatpush.bf16.msra.mxu1 %v314_v50  ;;  %v599_v49 = vld [vmem:[%s949_s3 + $0x10] sm:$0xff] }
  0xd6   :  { %602 = vmatpush.bf16.msra.mxu2 %v314_v50  ;;  %603 = vmatpush.bf16.msra.mxu3 %v314_v50  ;;  %v600_v50 = vld [vmem:[%s949_s3 + $0x18] sm:$0xff]  ;;  %s704_s3 = smov [#allocation3]  }
  0xd7   :  { %646 = vtanh.f32 %v299_v51  ;;  %v146_v56 = vpop.permute.xlu1 %145 }
  0xd8   :  { %648 = vtanh.f32 %v300_v52  ;;  %v177_v34 = vmul.f32 %v834_v57, %v146_v56  ;;  %v186_v57 = vadd.f32 %v178_v16, %v827_v43  ;;  %v469_v43 = vld [vmem:[%s951_s5 + $0x20] sm:$0xff] }
  0xd9   :  { %503 = vperm.xlu0 %641, %v469_v43  }
  0xda   :  { %v185_v20 = vadd.f32 %v177_v34, %v816_v29 }
  0xdb   :  { %v339_v52 = vpop.permute.xlu2 %338 }
  0xdc   :  { %v234_v31 = vadd.f32 %v226_v27, %v185_v20 }
  0xdd   :  { %v647_v1 = vpop.eup %646 }
  0xde   :  { %v649_v5 = vpop.eup %648  ;;  %v283_v35 = vadd.f32 %v275_v24, %v234_v31 }
  0xdf   :  { %v313_v9 = vpack.c.bf16 %v649_v5, %v647_v1 }
  0xe0   :  { %v252_v53 = vpop.permute.xlu1 %251 }
  0xe1   :  { %v277_v12 = vmul.f32 %v843_v63, %v252_v53  ;;  %409 = vmatpush.bf16.msra.mxu0 %v313_v9  ;;  %604 = vmatpush.bf16.msra.mxu1 %v313_v9  ;;  %v468_v63 = vld [vmem:[%s951_s5 + $0x18] sm:$0xff]  ;;  %s566_s5 = sshll.u32 %s704_s3, 4  ;;  %s567_s5 = int_to_ptr.vmem [resolvable:$true] %s566_s5 }
  0xe2   :  { %605 = vmatpush.bf16.msra.mxu2 %v313_v9  ;;  %606 = vmatpush.bf16.msra.mxu3 %v313_v9 }
  0xe3   :  { %v285_v14 = vadd.f32 %v277_v12, %v236_v42  ;;  %498 = vperm.xlu2 %640, %v468_v63   ;;  %518 = vperm.xlu0 %641, %v472_v40  }
  0xe5   :  { %v292_v17 = vpack.c.bf16 %v286_v13, %v285_v14 }
  0xe7   :  { %v297_v25 = vunpack.c.l.bf16 %v292_v17  ;;  %v298_v26 = vunpack.c.h.bf16 %v292_v17 }
  0xe9   :  { %650 = vtanh.f32 %v297_v25  ;;  %v199_v30 = vpop.permute.xlu1 %198 }
  0xea   :  { %652 = vtanh.f32 %v298_v26  ;;  %v227_v29 = vmul.f32 %v837_v59, %v199_v30 }
  0xeb   :  { %513 = vperm.xlu2 %640, %v471_v48  }
  0xec   :  { %v235_v33 = vadd.f32 %v227_v29, %v186_v57 }
  0xee   :  { %v284_v36 = vadd.f32 %v276_v32, %v235_v33 }
  0xef   :  { %v651_v37 = vpop.eup %650 }
  0xf0   :  { %v653_v38 = vpop.eup %652  ;;  %v291_v39 = vpack.c.bf16 %v284_v36, %v283_v35 }
  0xf1   :  { %v312_v22 = vpack.c.bf16 %v653_v38, %v651_v37 }
  0xf2   :  { %v295_v59 = vunpack.c.l.bf16 %v291_v39  ;;  %v296_v21 = vunpack.c.h.bf16 %v291_v39  ;;  %v334_v51 = vpop.permute.xlu1 %333 }
  0xf3   :  { %410 = vmatpush.bf16.msra.mxu0 %v312_v22  ;;  %607 = vmatpush.bf16.msra.mxu1 %v312_v22 }
  0xf4   :  { %654 = vtanh.f32 %v295_v59  ;;  %608 = vmatpush.bf16.msra.mxu2 %v312_v22  ;;  %609 = vmatpush.bf16.msra.mxu3 %v312_v22 }
  0xf5   :  { %656 = vtanh.f32 %v296_v21 }
  0xfa   :  { %v655_v41 = vpop.eup %654  ;;  %v344_v54 = vpop.permute.xlu1 %343 }
  0xfb   :  { %v657_v44 = vpop.eup %656 }
  0xfc   :  { %v311_v45 = vpack.c.bf16 %v657_v44, %v655_v41 }
  0xfe   :  { %411 = vmatpush.bf16.msra.mxu0 %v311_v45  ;;  %610 = vmatpush.bf16.msra.mxu1 %v311_v45 }
  0xff   :  { %611 = vmatpush.bf16.msra.mxu2 %v311_v45  ;;  %612 = vmatpush.bf16.msra.mxu3 %v311_v45 }
 0x101   :  { %593 = vmatmul.msk.bf16.vlgmr.msra.gmra.mxu0 %vm391_vm0, %v597_v46  ;;  %594 = vmatmul.msk.bf16.vlgmr.msra.gmra.mxu1 %vm391_vm0, %v598_v47 }
 0x102   :  { %595 = vmatmul.msk.bf16.vlgmr.msra.gmra.mxu2 %vm391_vm0, %v599_v49  ;;  %596 = vmatmul.msk.bf16.vlgmr.msra.gmra.mxu3 %vm391_vm0, %v600_v50  ;;  %v359_v0 = vpop.permute.xlu1 %358 }
 0x109   :  { %v349_v55 = vpop.permute.xlu2 %348 }
 0x10a   :  { %v369_v16 = vpop.permute.xlu1 %368 }
 0x121   :  { %v354_v5 = vpop.permute.xlu0 %353 }
 0x122   :  { %v364_v3 = vpop.permute.xlu2 %363 }
 0x127   :  { %v494_v38 = vpop.permute.xlu1 %493 }
 0x12a   :  { %v484_v23 = vpop.permute.xlu2 %483 }
 0x139   :  { %v489_v28 = vpop.permute.xlu0 %488 }
 0x13d   :  { %v499_v40 = vpop.permute.xlu2 %498 }
 0x14b   :  { %v504_v46 = vpop.permute.xlu0 %503 }
 0x17e   :  { %v413_v56 = vpop.f32.mrf.mxu0  ;;  %v418_v58 = vpop.f32.mrf.mxu1 }
 0x17f   :  { %v414_v61 = vadd.f32 %v413_v56, %v334_v51  ;;  %v419_v62 = vadd.f32 %v418_v58, %v344_v54 }
 0x181   :  { %v433_v1 = vpack.c.bf16 %v414_v61, %v414_v61  ;;  %v435_v2 = vpack.c.bf16 %v419_v62, %v419_v62 }
 0x183   :  { %v441_v4 = vunpack.c.l.bf16 %v433_v1  ;;  %v443_v6 = vunpack.c.l.bf16 %v435_v2 }
 0x185   :  { %v423_v7 = vpop.f32.mrf.mxu2  ;;  %v428_v9 = vpop.f32.mrf.mxu3  ;;  %658 = vtanh.f32 %v441_v4 }
 0x186   :  { %v424_v8 = vadd.f32 %v423_v7, %v354_v5  ;;  %v429_v10 = vadd.f32 %v428_v9, %v364_v3  ;;  %v415_v53 = vpop.f32.mrf.mxu0  ;;  %v420_v11 = vpop.f32.mrf.mxu1  ;;  %660 = vtanh.f32 %v443_v6 }
 0x187   :  { %v416_v42 = vadd.f32 %v415_v53, %v339_v52  ;;  %v421_v12 = vadd.f32 %v420_v11, %v349_v55  ;;  %v509_v5 = vpop.permute.xlu1 %508 }
 0x188   :  { %v437_v34 = vpack.c.bf16 %v424_v8, %v424_v8  ;;  %v439_v13 = vpack.c.bf16 %v429_v10, %v429_v10  ;;  %v514_v10 = vpop.permute.xlu2 %513 }
 0x189   :  { %v434_v14 = vpack.c.bf16 %v416_v42, %v416_v42  ;;  %v436_v15 = vpack.c.bf16 %v421_v12, %v421_v12  ;;  %v519_v12 = vpop.permute.xlu0 %518 }
 0x18a   :  { %v445_v17 = vunpack.c.l.bf16 %v437_v34  ;;  %v447_v25 = vunpack.c.l.bf16 %v439_v13 }
 0x18b   :  { %v442_v18 = vunpack.c.l.bf16 %v434_v14  ;;  %v444_v19 = vunpack.c.l.bf16 %v436_v15  ;;  %v659_v20 = vpop.eup %658 }
 0x18c   :  { %662 = vtanh.f32 %v445_v17  ;;  %v661_v57 = vpop.eup %660  ;;  %v457_v24 = vpack.c.bf16 %v659_v20, %v659_v20 }
 0x18d   :  { %v425_v26 = vpop.f32.mrf.mxu2  ;;  %v430_v27 = vpop.f32.mrf.mxu3  ;;  %664 = vtanh.f32 %v442_v18  ;;  %v459_v33 = vpack.c.bf16 %v661_v57, %v661_v57 }
 0x18e   :  { %v426_v30 = vadd.f32 %v425_v26, %v359_v0  ;;  %v431_v31 = vadd.f32 %v430_v27, %v369_v16  ;;  %666 = vtanh.f32 %v444_v19  ;;  %v473_v36 = vunpack.c.l.bf16 %v457_v24 }
 0x18f   :  { %668 = vtanh.f32 %v447_v25  ;;  %v475_v22 = vunpack.c.l.bf16 %v459_v33  ;;  %v555_v27 = vpop.permute.xlu1 %554 }
 0x190   :  { %v438_v29 = vpack.c.bf16 %v426_v30, %v426_v30  ;;  %v440_v32 = vpack.c.bf16 %v431_v31, %v431_v31  ;;  %v521_v44 = vmul.f32 %v484_v23, %v473_v36 }
 0x191   :  { %v523_v48 = vmul.f32 %v494_v38, %v475_v22 }
 0x192   :  { %v663_v60 = vpop.eup %662  ;;  %v446_v43 = vunpack.c.l.bf16 %v438_v29  ;;  %v448_v35 = vunpack.c.l.bf16 %v440_v32  ;;  %v530_v55 = vsel %vm529_vm1, %v521_v44, 0.0 }
 0x193   :  { %v665_v37 = vpop.eup %664  ;;  %v461_v59 = vpack.c.bf16 %v663_v60, %v663_v60  ;;  %v533_v1 = vsel %vm529_vm1, %v523_v48, 0.0 }
 0x194   :  { %670 = vtanh.f32 %v446_v43  ;;  %v667_v39 = vpop.eup %666  ;;  %v458_v21 = vpack.c.bf16 %v665_v37, %v665_v37 }
 0x195   :  { %672 = vtanh.f32 %v448_v35  ;;  %v669_v63 = vpop.eup %668  ;;  %v460_v41 = vpack.c.bf16 %v667_v39, %v667_v39  ;;  %v477_v49 = vunpack.c.l.bf16 %v461_v59 }
 0x196   :  { %v474_v45 = vunpack.c.l.bf16 %v458_v21  ;;  %v463_v50 = vpack.c.bf16 %v669_v63, %v669_v63 }
 0x197   :  { %v476_v47 = vunpack.c.l.bf16 %v460_v41  ;;  %v525_v2 = vmul.f32 %v504_v46, %v477_v49 }
 0x198   :  { %v522_v51 = vmul.f32 %v489_v28, %v474_v45  ;;  %v479_v3 = vunpack.c.l.bf16 %v463_v50  ;;  %v557_v28 = vperm.slane %v555_v27, 0 }
 0x199   :  { %v524_v58 = vmul.f32 %v499_v40, %v476_v47  ;;  %v537_v11 = vsel %vm529_vm1, %v525_v2, 0.0 }
 0x19a   :  { %v671_v52 = vpop.eup %670  ;;  %v531_v56 = vsel %vm529_vm1, %v522_v51, 0.0  ;;  %v527_v42 = vmul.f32 %v514_v10, %v479_v3 }
 0x19b   :  { %v673_v54 = vpop.eup %672  ;;  %v462_v61 = vpack.c.bf16 %v671_v52, %v671_v52  ;;  %v532_v62 = vadd.f32 %v531_v56, %v530_v55  ;;  %v535_v7 = vsel %vm529_vm1, %v524_v58, 0.0 }
 0x19c   :  { %v464_v0 = vpack.c.bf16 %v673_v54, %v673_v54  ;;  %v541_v16 = vsel %vm529_vm1, %v527_v42, 0.0 }
 0x19d   :  { %v478_v4 = vunpack.c.l.bf16 %v462_v61  ;;  %v534_v6 = vadd.f32 %v533_v1, %v532_v62 }
 0x19e   :  { %v480_v8 = vunpack.c.l.bf16 %v464_v0 }
 0x19f   :  { %v526_v9 = vmul.f32 %v509_v5, %v478_v4  ;;  %v536_v53 = vadd.f32 %v535_v7, %v534_v6 }
 0x1a0   :  { %v528_v14 = vmul.f32 %v519_v12, %v480_v8 }
 0x1a1   :  { %v538_v34 = vadd.f32 %v537_v11, %v536_v53  ;;  %v539_v13 = vsel %vm529_vm1, %v526_v9, 0.0 }
 0x1a2   :  { %v543_v18 = vsel %vm529_vm1, %v528_v14, 0.0 }
 0x1a3   :  { %v540_v15 = vadd.f32 %v539_v13, %v538_v34 }
 0x1a5   :  { %v542_v17 = vadd.f32 %v541_v16, %v540_v15 }
 0x1a7   :  { %v544_v19 = vadd.f32 %v543_v18, %v542_v17 }
 0x1a9   :  { %v545_v20 = vrot.slane %v544_v19, 4 }
 0x1ab   :  { %v546_v23 = vadd.f32 %v545_v20, %v544_v19 }
 0x1ad   :  { %v547_v25 = vrot.slane %v546_v23, 2 }
 0x1af   :  { %v548_v26 = vadd.f32 %v547_v25, %v546_v23 }
 0x1b1   :  { %v549_v57 = vrot.slane %v548_v26, 1 }
 0x1b3   :  { %v550_v30 = vadd.f32 %v549_v57, %v548_v26 }
 0x1b5   :  { %v558_v31 = vadd.f32 %v557_v28, %v550_v30 }
 0x1b7   :  { %560 = vst.msk [vmem:[#allocation3] sm:$0x1] %vm559_vm2, %v558_v31 }
 0x1b8   :  { %571 = dma.vmem_to_hbm [thread:$0]  %s567_s5, 16, %s569_s23, [#allocation4]  }
 0x1b9   :  { %698 = dma.done.wait [#allocation4], 16  }
 0x1ba   :  { %699 = vsyncadd [#allocation4], 4294967280 }
 0x1bb   :  { %576 = vsyncpa [#allocation4], 1 }

</bundles_post_ra>
